<compile_context>
chip_gen: v7x
topology: tpu7x:2x2x1
jax: 0.10.0
libtpu: 0.0.40
codegen_flags: <defaults>
</compile_context>

<pallas_src>
import jax
import jax.numpy as jnp
from jax import lax
from jax.experimental import pallas as pl
from jax.experimental.pallas import tpu as pltpu

# RoBERTa-like special token ids (deterministic constants, no checkpoint load).
BOS_ID = 0
PAD_ID = 1
EOS_ID = 2
MASK_ID = 50264

MAX_LEN = 128   # tokenizer max_length padding
B = 8           # batch of turns
PROMPT_LEN = 8  # encoded prompt length: [BOS, tok, EOS, PAD...]

# Below this input size the kernel is pure launch overhead -> plain jnp.
KERNEL_MIN_INPUT_BYTES = 512 * 1024
# Max rows per batch tile: 8192x128 int32 in + int8 out + pos out, double
# buffered, is ~10 MiB VMEM -> fits the default scoped limit on v5e/v6e/v7x.
TB_CAP = 8192


def _round_up(x, m):
    return (x + m - 1) // m * m


def make_prompt_kernel(pad_id: int, mask_id: int):
    """Kernel factory: pad/mask ids are compile-time constants."""

    def prompt_kernel(ids_ref,        # (tb, L) int32  VMEM
                      mask_out_ref,   # (tb, L) int8   VMEM
                      pos_out_ref):   # (1, tb) int32  VMEM (lane-dense)
        ids = ids_ref[...]                                    # (tb, L)
        L = ids.shape[1]

        # attention_mask: 1 where not padding (elementwise, VPU). int8 store
        # quarters the HBM write bytes of the dominant output stream.
        mask_out_ref[...] = (ids != pad_id).astype(jnp.int8)

        # mlm_pos: first position where ids == <mask> (lane min-reduce, XLU).
        col = lax.broadcasted_iota(jnp.int32, ids.shape, 1)   # column index
        cand = jnp.where(ids == mask_id, col, jnp.int32(L))
        first = jnp.min(cand, axis=1)                         # (tb,)
        # Match torch argmax/nonzero-derived semantics: 0 when no <mask>.
        first = jnp.where(first == L, jnp.int32(0), first)
        # Lane-dense store: one unmasked row instead of tb masked sublanes.
        pos_out_ref[...] = first[None, :]                     # (1, tb)

    return prompt_kernel


def prompt_forward(ids, prompt_ids, pad_id=PAD_ID, mask_id=MASK_ID,
                   force_kernel=False):
    """Returns (ids, masks, mlm_tokens, mlm_pos), mirroring the torch module.

    Only the mask + <mask>-position math runs in the Pallas kernel; the ids
    pass-through and the label-token slice are zero-cost wrapper ops.
    Outputs are int8 (mask) / int32 (positions); the torch module uses int64.
    """
    Bn, L = ids.shape

    # mlm_tokens: tokenizer.encode(first prompt sub-token)[1] -> the token id
    # right after BOS in the encoded prompt.  Pure static slice; no kernel.
    mlm_tokens = prompt_ids[:, 1:2].astype(jnp.int32)

    in_bytes = Bn * L * ids.dtype.itemsize
    if (not force_kernel) and in_bytes < KERNEL_MIN_INPUT_BYTES:
        # Tiny-batch bypass: a handful of VPU/XLU ops; a custom-call launch
        # plus per-grid-step overhead would dwarf the actual work.
        masks = (ids != pad_id).astype(jnp.int8)
        mlm_pos = jnp.argmax((ids == mask_id).astype(jnp.int32),
                             axis=1).astype(jnp.int32)[:, None]
        return ids, masks, mlm_tokens, mlm_pos

    # ---- batch tiling ------------------------------------------------------
    # Big lane-dense tiles amortize the ~0.35us/step overhead; keep >= 2 grid
    # steps for non-tiny batches so v7x's two TensorCores both stream HBM.
    steps = pl.cdiv(Bn, TB_CAP)
    if Bn >= 256:
        steps = max(steps, 2)
    if steps == 1:
        tb = Bn                 # single full-batch block; no alignment needed
        Bp = Bn
    else:
        # tb multiple of 128: lane-dense pos block + int8 sublane tiling OK.
        tb = _round_up(pl.cdiv(Bn, steps), 128)
        Bp = steps * tb

    ids_p = ids if Bp == Bn else jnp.pad(
        ids, ((0, Bp - Bn), (0, 0)), constant_values=pad_id)

    masks_p, pos_p = pl.pallas_call(
        make_prompt_kernel(pad_id, mask_id),
        out_shape=(
            jax.ShapeDtypeStruct((Bp, L), jnp.int8),    # attention masks
            jax.ShapeDtypeStruct((1, Bp), jnp.int32),   # mlm_pos (lane-dense)
        ),
        grid_spec=pltpu.PrefetchScalarGridSpec(
            num_scalar_prefetch=0,
            grid=(steps,),
            in_specs=[pl.BlockSpec((tb, L), lambda i: (i, 0))],
            out_specs=[
                pl.BlockSpec((tb, L), lambda i: (i, 0)),
                pl.BlockSpec((1, tb), lambda i: (0, i)),   # tile along lanes
            ],
        ),
        compiler_params=pltpu.CompilerParams(
            dimension_semantics=("parallel",)),
        cost_estimate=pl.CostEstimate(
            flops=2 * Bp * L,
            transcendentals=0,
            bytes_accessed=Bp * L * 4 + Bp * L * 1 + Bp * 4),
    )(ids_p)

    masks = masks_p[:Bn]
    mlm_pos = pos_p[0, :Bn][:, None]

    return ids, masks, mlm_tokens, mlm_pos


def _build_synthetic_batch(key):
    """Deterministic stand-in for RobertaTokenizer.encode_plus output.

    Each row: [BOS, content..., <mask>, EOS, PAD, PAD, ...]
    """
    k1, k2, k3 = jax.random.split(key, 3)
    lens = jax.random.randint(k1, (B,), 5, 20)              # content token count
    body = jax.random.randint(k2, (B, MAX_LEN), 4, 1000)    # ordinary vocab ids
    pos = jnp.arange(MAX_LEN)[None, :]

    ids = body
    ids = jnp.where(pos == 0, BOS_ID, ids)
    mask_pos = lens[:, None] + 1
    eos_pos = lens[:, None] + 2
    ids = jnp.where(pos == mask_pos, MASK_ID, ids)
    ids = jnp.where(pos == eos_pos, EOS_ID, ids)
    ids = jnp.where(pos > eos_pos, PAD_ID, ids)
    ids = ids.astype(jnp.int32)

    # Make the last row mask-free to exercise the no-<mask> sentinel path.
    row = jnp.arange(B)[:, None]
    ids = jnp.where((row == B - 1) & (ids == MASK_ID), jnp.int32(7), ids)

    # encoded prompts: [BOS, label_token, EOS, PAD...]
    ptok = jax.random.randint(k3, (B, 1), 4, 1000)
    prompt_ids = jnp.concatenate(
        [jnp.full((B, 1), BOS_ID, jnp.int32),
         ptok.astype(jnp.int32),
         jnp.full((B, 1), EOS_ID, jnp.int32),
         jnp.full((B, PROMPT_LEN - 3), PAD_ID, jnp.int32)], axis=1)

    return ids, prompt_ids, lens


if __name__ == "__main__":
    # TODO(synk): the HuggingFace RobertaTokenizer string->id step has no Pallas
    # equivalent; token ids are synthesized deterministically above instead.
    key = jax.random.PRNGKey(0)
    ids, prompt_ids, lens = _build_synthetic_batch(key)

    # Force the Pallas kernel path once (the auto heuristic would bypass it
    # at this demo size).
    out_kernel = jax.block_until_ready(
        prompt_forward(ids, prompt_ids, force_kernel=True))
    out_ids, out_masks, out_mlm_tok, out_mlm_pos = out_kernel

    # Also exercise the tiny-batch jnp bypass path.
    out_bypass = jax.block_until_ready(prompt_forward(ids, prompt_ids))

    # Pure-JAX reference for correctness.
    ref_masks = (ids != PAD_ID).astype(jnp.int8)
    ref_pos = jnp.argmax((ids == MASK_ID).astype(jnp.int32),
                         axis=1).astype(jnp.int32)[:, None]
    ref_tok = prompt_ids[:, 1:2]

    assert jnp.array_equal(out_ids, ids)
    assert jnp.array_equal(out_masks, ref_masks)
    assert jnp.array_equal(out_mlm_pos, ref_pos)
    assert jnp.array_equal(out_mlm_tok, ref_tok)
    # no-<mask> row must return position 0 (argmax semantics)
    assert int(out_mlm_pos[B - 1, 0]) == 0
    # kernel path and bypass path must agree exactly
    for a, b in zip(out_kernel, out_bypass):
        assert jnp.array_equal(a, b)

    print("KERNEL_OK")
</pallas_src>

<mosaic_0001>
module attributes {stable_mosaic.version = 11 : i64} {
  func.func @prompt_kernel(%arg0: i32, %arg1: memref<8x128xi32, #tpu.memory_space<vmem>>, %arg2: memref<8x128xi8, #tpu.memory_space<vmem>>, %arg3: memref<1x8xi32, #tpu.memory_space<vmem>>) attributes {dimension_semantics = [#tpu.dimension_semantics<parallel>], iteration_bounds = array<i64: 1>, scalar_prefetch = 0 : i64, scratch_operands = 0 : i64, tpu.core_type = #tpu.core_type<tc>, window_params = [{transform_indices = @transform_0, window_bounds = array<i64: 8, 128>}, {transform_indices = @transform_1, window_bounds = array<i64: 8, 128>}, {transform_indices = @transform_2, window_bounds = array<i64: 1, 8>}]} {
    %c0 = arith.constant 0 : index
    %c0_0 = arith.constant 0 : index
    %0 = vector.load %arg1[%c0, %c0_0] : memref<8x128xi32, #tpu.memory_space<vmem>>, vector<8x128xi32>
    %c1_i32 = arith.constant 1 : i32
    %1 = vector.broadcast %c1_i32 : i32 to vector<8x128xi32>
    %2 = arith.cmpi ne, %0, %1 : vector<8x128xi32>
    %3 = arith.extui %2 : vector<8x128xi1> to vector<8x128xi8>
    %c0_1 = arith.constant 0 : index
    %c0_2 = arith.constant 0 : index
    %4 = vector.load %arg2[%c0_1, %c0_2] : memref<8x128xi8, #tpu.memory_space<vmem>>, vector<8x128xi8>
    tpu.vector_store %arg2[%c0_1, %c0_2], %3 {strides = array<i32>} : memref<8x128xi8, #tpu.memory_space<vmem>>, vector<8x128xi8>,
    %5 = tpu.iota {dimensions = array<i32: 1>} : vector<8x128xi32>
    %c50264_i32 = arith.constant 50264 : i32
    %6 = vector.broadcast %c50264_i32 : i32 to vector<8x128xi32>
    %7 = arith.cmpi eq, %0, %6 : vector<8x128xi32>
    %c128_i32 = arith.constant 128 : i32
    %8 = vector.broadcast %c128_i32 : i32 to vector<8x128xi32>
    %9 = arith.select %7, %5, %8 : vector<8x128xi1>, vector<8x128xi32>
    %cst = arith.constant dense<2147483647> : vector<8xi32>
    %10 = vector.multi_reduction <minsi>, %9, %cst [1] : vector<8x128xi32> to vector<8xi32>
    %c128_i32_3 = arith.constant 128 : i32
    %11 = vector.broadcast %c128_i32_3 : i32 to vector<8xi32>
    %12 = arith.cmpi eq, %10, %11 : vector<8xi32>
    %c0_i32 = arith.constant 0 : i32
    %13 = vector.broadcast %c0_i32 : i32 to vector<8xi32>
    %14 = arith.select %12, %13, %10 : vector<8xi1>, vector<8xi32>
    %15 = vector.shape_cast %14 : vector<8xi32> to vector<1x8xi32>
    %c0_4 = arith.constant 0 : index
    %c0_5 = arith.constant 0 : index
    %16 = vector.load %arg3[%c0_4, %c0_5] : memref<1x8xi32, #tpu.memory_space<vmem>>, vector<1x8xi32>
    tpu.vector_store %arg3[%c0_4, %c0_5], %15 {strides = array<i32>} : memref<1x8xi32, #tpu.memory_space<vmem>>, vector<1x8xi32>,
    return
  }
  func.func @transform_0(%arg0: i32) -> (i32, i32) {
    %c0_i32 = arith.constant 0 : i32
    %c0_i32_0 = arith.constant 0 : i32
    return %arg0, %c0_i32 : i32, i32
  }
  func.func @transform_1(%arg0: i32) -> (i32, i32) {
    %c0_i32 = arith.constant 0 : i32
    %c0_i32_0 = arith.constant 0 : i32
    return %arg0, %c0_i32 : i32, i32
  }
  func.func @transform_2(%arg0: i32) -> (i32, i32) {
    %c0_i32 = arith.constant 0 : i32
    %c0_i32_0 = arith.constant 0 : i32
    return %c0_i32, %arg0 : i32, i32
  }
}

</mosaic_0001>

<bundles_post_ra>
// kernel: tpu_custom_call.1
= control target key start
LH: loop header
LB: loop body
LE: loop exit
PB: predicated region body
PF: predicated region fallthrough
CT: control target
= control target key end

     0   :  { %8 = vsyncpa [#allocation3], 0  ;;  %s218_s0 = inlined_call_operand.hbm [shape: s32[8,128], index: 0, kind: input, shape index: {}]   ;;  %s219_s1 = inlined_call_operand.hbm [shape: s8[8,128], index: 1, kind: output, shape index: {0}]   ;;  %s220_s2 = inlined_call_operand.hbm [shape: s32[1,8], index: 2, kind: output, shape index: {1}]  }
   0x1   :  { %9 = vsyncpa [#allocation4], 0 }
   0x2   :  { %10 = vsyncpa [#allocation7], 0  ;;  %s163_s9 = smov [#allocation2]   ;;  %s91_s13 = scalar_lea.hbm %s218_s0, 128 }
   0x3   :  { %s17_s10 = sshll.u32 %s163_s9, 4  ;;  %p92_p0 = scmp.ne.s32.totalorder %s218_s0, %s91_s13  ;;  %s18_s10 = int_to_ptr.vmem [resolvable:$true] %s17_s10 }
   0x4   :  { %p95_p1 = scmp.lt.u32.totalorder %s91_s13, %s218_s0 }
   0x6   :  { %p97_p2 = pnand %p95_p1, %p92_p0 }
   0x8   :  { %100 = shalt.err (!%p97_p2)
}
   0x9   :  { %s101_s18 = scalar_lea.vmem %s18_s10, 128  ;;  %p106_p4 = scmp.lt.s32.totalorder %s18_s10, %s18_s10 }
   0xa   :  { %p102_p3 = scmp.ne.s32.totalorder %s18_s10, %s101_s18  ;;  %p107_p5 = scmp.lt.s32.totalorder %s101_s18, %s101_s18 }
   0xc   :  { %p108_p6 = por %p107_p5, %p106_p4 }
   0xe   :  { %p109_p7 = pnand %p108_p6, %p102_p3 }
  0x10   :  { %112 = shalt.err (!%p109_p7)
}
  0x11   :  { %20 = dma.hbm_to_vmem [thread:$0]  %s218_s0, 128, %s18_s10, [#allocation3]  }
  0x12   :  { %157 = dma.done.wait [#allocation3], 128  }
  0x13   :  { %158 = vsyncadd [#allocation3], 4294967168  ;;  %v32_v0 = vlaneseq  ;;  %v26_v2 = vld [vmem:[#allocation2] sm:$0xff]  ;;  %v164_v12 = vmov 0   ;;  %s165_s0 = smov [#allocation5]  }
  0x14   :  { %vm34_vm0 = vcmp.eq.s32.totalorder %v26_v2, 50264  ;;  %vm27_vm2 = vcmp.ne.s32.totalorder %v26_v2, 1  ;;  %s64_s21 = sshll.u32 %s165_s0, 4  ;;  %s65_s21 = int_to_ptr.vmem [resolvable:$true] %s64_s21 }
  0x15   :  { %v33_v1 = vand.u32 127, %v32_v0  ;;  %v53_v6 = vshrl.u32 %v32_v0, 7  ;;  %vm28_vm3 = vmpackc.low %vm27_vm2, %vm27_vm2  ;;  %s113_s22 = scalar_lea.vmem %s65_s21, 32  ;;  %p118_p9 = scmp.lt.s32.totalorder %s65_s21, %s65_s21 }
  0x16   :  { %vm29_vm4 = vmpackc.even %vm28_vm3, %vm28_vm3  ;;  %p114_p8 = scmp.ne.s32.totalorder %s65_s21, %s113_s22  ;;  %p119_p10 = scmp.lt.s32.totalorder %s113_s22, %s113_s22 }
  0x17   :  { %v35_v3 = vsel %vm34_vm0, %v33_v1, 128  ;;  %v54_v7 = vsub.s32 %v33_v1, %v53_v6  ;;  %v30_v13 = vsel %vm29_vm4, 16843009, %v164_v12 }
  0x18   :  { %v37_v4 = vshra.s32 %v35_v3, 16  ;;  %v36_v8 = vand.u32 65535, %v35_v3  ;;  %31 = vst [vmem:[#allocation5] sm:$0x3] %v30_v13  ;;  %p120_p11 = por %p119_p10, %p118_p9 }
  0x1a   :  { %v39_v5 = vcvt.s32.f32 %v37_v4  ;;  %v38_v9 = vcvt.s32.f32 %v36_v8  ;;  %p121_p12 = pnand %p120_p11, %p114_p8 }
  0x1c   :  { %40 = vmin.xlane.f32.xlu0 %v39_v5 }
  0xa9   :  { %v41_v10 = vpop.xlane.xlu0 %40 }
  0xaa   :  { %vm42_vm1 = vcmp.eq.f32.partialorder %v39_v5, %v41_v10 }
  0xab   :  { %v43_v11 = vsel %vm42_vm1, %v38_v9, inf }
  0xac   :  { %44 = vmin.xlane.f32.xlu0 %v43_v11 }
  0xad   :  { %124 = shalt.err (!%p121_p12)
}
  0xae   :  { %s125_s25 = scalar_lea.hbm %s219_s1, 32 }
  0xaf   :  { %p126_p13 = scmp.ne.s32.totalorder %s219_s1, %s125_s25  ;;  %p129_p0 = scmp.lt.u32.totalorder %s125_s25, %s219_s1 }
  0xb1   :  { %p131_p1 = pnand %p129_p0, %p126_p13 }
  0xb3   :  { %134 = shalt.err (!%p131_p1)
}
  0xb4   :  { %67 = dma.vmem_to_hbm [thread:$0]  %s65_s21, 32, %s219_s1, [#allocation4]   ;;  %v47_v14 = vcvt.f32.s32 %v41_v10  ;;  %vm56_vm6 = vcmask 57344  }
  0xb5   :  { %s166_s4 = smov [#allocation6]  }
  0xb6   :  { %v48_v16 = vshll.u32 %v47_v14, 16  ;;  %s74_s5 = sshll.u32 %s166_s4, 4  ;;  %s75_s5 = int_to_ptr.vmem [resolvable:$true] %s74_s5 }
  0xb7   :  { %s135_s6 = scalar_lea.vmem %s75_s5, 16  ;;  %s139_s7 = scalar_lea.vmem %s75_s5, 32 }
  0xb8   :  { %p136_p2 = scmp.ne.s32.totalorder %s75_s5, %s135_s6  ;;  %p140_p3 = scmp.lt.s32.totalorder %s75_s5, %s75_s5 }
  0xb9   :  { %p141_p4 = scmp.lt.s32.totalorder %s139_s7, %s135_s6 }
  0xbb   :  { %p142_p5 = por %p141_p4, %p140_p3 }
  0xbd   :  { %p143_p6 = pnand %p142_p5, %p136_p2 }
 0x139   :  { %v45_v15 = vpop.xlane.xlu0 %44 }
 0x13a   :  { %v46_v17 = vcvt.f32.s32 %v45_v15 }
 0x13c   :  { %v49_v18 = vadd.s32 %v48_v16, %v46_v17 }
 0x13e   :  { %vm50_vm5 = vcmp.eq.s32.totalorder %v49_v18, 128 }
 0x13f   :  { %v51_v19 = vsel %vm50_vm5, 0, %v49_v18 }
 0x140   :  { %v55_v20 = vrot.slane %v51_v19, %v54_v7 }
 0x142   :  { %57 = vst.msk [vmem:[#allocation6] sm:$0x1] %vm56_vm6, %v55_v20 }
 0x143   :  { %146 = shalt.err (!%p143_p6)
}
 0x144   :  { %s147_s9 = scalar_lea.hbm %s220_s2, 16 }
 0x145   :  { %p148_p7 = scmp.ne.s32.totalorder %s220_s2, %s147_s9  ;;  %p151_p8 = scmp.lt.u32.totalorder %s147_s9, %s220_s2 }
 0x147   :  { %p153_p9 = pnand %p151_p8, %p148_p7 }
 0x149   :  { %156 = shalt.err (!%p153_p9)
}
 0x14a   :  { %77 = dma.vmem_to_hbm [thread:$0]  %s75_s5, 16, %s220_s2, [#allocation7]  }
 0x14b   :  { %159 = dma.done.wait [#allocation4], 32  }
 0x14c   :  { %160 = vsyncadd [#allocation4], 4294967264 }
 0x14d   :  { %161 = dma.done.wait [#allocation7], 16  }
 0x14e   :  { %162 = vsyncadd [#allocation7], 4294967280 }
 0x14f   :  { %84 = vsyncpa [#allocation3], 1 }
 0x150   :  { %85 = vsyncpa [#allocation4], 1 }
 0x151   :  { %86 = vsyncpa [#allocation7], 1 }

</bundles_post_ra>
